<compile_context>
chip_gen: v6e
topology: v6e:2x2x1
jax: 0.10.0
libtpu: 0.0.40
codegen_flags: <defaults>
</compile_context>

<pallas_src>
import functools

import jax
import jax.numpy as jnp
from jax.experimental import pallas as pl
from jax.experimental.pallas import tpu as pltpu


# --------------------------------------------------------------------------- #
# Kernels
# --------------------------------------------------------------------------- #
def _inputs_rows_kernel(x_ref, num_ref, cat_ref, wbd_ref, out_ref, *, offsets):
    """seq_last=False tile over (B*T) flattened rows.

    x_ref:   (tm, Dx)          float
    num_ref: (tm, Dn)          float
    cat_ref: (tm, K)           int32 (raw indices; vocab offsets are static consts)
    wbd_ref: (Vtot, Etot)      block-diagonal fused embedding table
    out_ref: (tm, Dx+Dn+Etot)
    """
    tm = x_ref.shape[0]
    vtot = wbd_ref.shape[0]
    w = wbd_ref[...]
    cat = cat_ref[...]

    # One iota for all K features; vocab ranges are disjoint, so the OR of the
    # per-feature one-hots is a multi-hot selecting all K embedding rows.
    iota = jax.lax.broadcasted_iota(jnp.int32, (tm, vtot), 1)
    hot = None
    for d, off in enumerate(offsets):
        h = (cat[:, d:d + 1] + off) == iota
        hot = h if hot is None else jnp.logical_or(hot, h)

    # Single MXU pass -> all K embeddings, already concatenated along lanes.
    emb = jnp.dot(hot.astype(w.dtype), w, preferred_element_type=jnp.float32)

    out_ref[...] = jnp.concatenate(
        [x_ref[...].astype(jnp.float32),
         num_ref[...].astype(jnp.float32),
         emb], axis=1).astype(out_ref.dtype)
    # TODO(synk): nn.Dropout(p=0.0) is the identity; nonzero training dropout would
    # use pltpu.prng_seed + pltpu.prng_random_bits here.


def _inputs_seq_last_kernel(x_ref, num_ref, cat_ref, wbd_t_ref, out_ref, *, offsets):
    """seq_last=True tile: channels on sublanes, time on lanes (lane-dense store).

    x_ref:   (1, Cx, tt)   num_ref: (1, Cn, tt)   cat_ref: (1, K, tt) int32
    wbd_t_ref: (Etot, Vtot)  transposed fused table
    out_ref: (1, Cx+Cn+Etot, tt)
    """
    tt = x_ref.shape[2]
    vtot = wbd_t_ref.shape[1]
    wt = wbd_t_ref[...]
    xv = x_ref[...][0]          # (Cx, tt)
    nv = num_ref[...][0]        # (Cn, tt)
    cat = cat_ref[...][0]       # (K,  tt)

    iota = jax.lax.broadcasted_iota(jnp.int32, (vtot, tt), 0)
    hot = None
    for d, off in enumerate(offsets):
        h = (cat[d:d + 1, :] + off) == iota
        hot = h if hot is None else jnp.logical_or(hot, h)

    emb = jnp.dot(wt, hot.astype(wt.dtype),
                  preferred_element_type=jnp.float32)        # (Etot, tt)

    res = jnp.concatenate(
        [xv.astype(jnp.float32), nv.astype(jnp.float32), emb], axis=0)
    out_ref[...] = res[None].astype(out_ref.dtype)            # full-width lane store


# --------------------------------------------------------------------------- #
# One-time table fusion (hoisted out of the per-call forward path)
# --------------------------------------------------------------------------- #
def build_fused_table(embed_weights, table_dtype=jnp.float32):
    """Fuse K embedding tables into one block-diagonal (Vtot, Etot) table.

    Build once and reuse across forward calls.  Returns
    (wbd, wbd_transposed, vocab_offsets, (Vtot, Etot)).
    """
    vocabs = [int(w.shape[0]) for w in embed_weights]
    edims = [int(w.shape[1]) for w in embed_weights]
    vtot, etot = sum(vocabs), sum(edims)
    wbd = jnp.zeros((vtot, etot), dtype=table_dtype)
    offsets = []
    voff = eoff = 0
    for w, v, e in zip(embed_weights, vocabs, edims):
        wbd = wbd.at[voff:voff + v, eoff:eoff + e].set(w.astype(table_dtype))
        offsets.append(voff)
        voff += v
        eoff += e
    return wbd, jnp.transpose(wbd), tuple(offsets), (vtot, etot)


# --------------------------------------------------------------------------- #
# Forward wrappers
# --------------------------------------------------------------------------- #
def inputs_forward(x, num, cat, wbd, offsets, *, tm=8192, out_dtype=jnp.float32):
    """seq_last=False. x:(B,T,Dx) num:(B,T,Dn) cat:(B,T,K)int -> (B,T,Dx+Dn+Etot)."""
    if num is None and cat is None:
        return x
    # TODO(synk): num-only / cat-only module configurations are not wired up here.
    B, T, Dx = x.shape
    Dn = num.shape[-1]
    K = cat.shape[-1]
    Vtot, Etot = int(wbd.shape[0]), int(wbd.shape[1])
    Dout = Dx + Dn + Etot
    R = B * T

    # Free reshapes only -- no pad, no trim, no offset-add pass over `cat`.
    xf = x.reshape(R, Dx)
    nf = num.reshape(R, Dn)
    cf = cat.reshape(R, K).astype(jnp.int32)

    # Large row tile to amortize the ~0.35us/grid-step overhead; multiple of 8
    # sublanes (or exactly R when R is small/ragged so the one block equals the
    # full array).  Ragged tails of large problems rely on Pallas partial-block
    # masking.  Shrink tm if you need more grid steps for megacore sharding.
    tm = int(tm)
    if R % 8 == 0:
        tm_eff = min(tm, R)
    elif R < tm:
        tm_eff = R
    else:
        tm_eff = tm
    grid = (pl.cdiv(R, tm_eff),)

    out_bytes = jnp.dtype(out_dtype).itemsize
    tbytes = jnp.dtype(wbd.dtype).itemsize
    # Fused table counted ONCE: constant index_map keeps it VMEM-resident.
    bytes_accessed = (R * Dx * xf.dtype.itemsize + R * Dn * nf.dtype.itemsize
                      + R * K * 4 + Vtot * Etot * tbytes + R * Dout * out_bytes)
    cost = pl.CostEstimate(flops=2 * R * Vtot * Etot, transcendentals=0,
                           bytes_accessed=int(bytes_accessed))

    # Double-buffered tiles + resident table + (tm, Vtot) multi-hot temp, + headroom.
    per_step = ((tm_eff * (Dx + Dn) * 4 + tm_eff * K * 4 + tm_eff * Dout * out_bytes) * 2
                + Vtot * Etot * tbytes + tm_eff * Vtot * 4)
    vmem_limit = int(min(100 * 2**20, max(32 * 2**20, 3 * per_step)))

    kernel = functools.partial(_inputs_rows_kernel, offsets=offsets)
    out = pl.pallas_call(
        kernel,
        out_shape=jax.ShapeDtypeStruct((R, Dout), out_dtype),
        grid=grid,
        in_specs=[
            pl.BlockSpec((tm_eff, Dx), lambda i: (i, 0)),
            pl.BlockSpec((tm_eff, Dn), lambda i: (i, 0)),
            pl.BlockSpec((tm_eff, K), lambda i: (i, 0)),
            # Constant block index => table DMA'd once, stays resident.  Use
            # pipeline_mode=pl.Buffered(1) here if the fused table gets large.
            pl.BlockSpec((Vtot, Etot), lambda i: (0, 0)),
        ],
        # Dout=20 (<128) means masked lane stores; kept because transposing back in
        # the wrapper would cost a full extra HBM pass over the output.  Use the
        # seq_last=True path below for a natively lane-dense output layout.
        out_specs=pl.BlockSpec((tm_eff, Dout), lambda i: (i, 0)),
        compiler_params=pltpu.CompilerParams(
            dimension_semantics=("parallel",),
            vmem_limit_bytes=vmem_limit),
        cost_estimate=cost,
    )(xf, nf, cf, wbd)
    return out.reshape(B, T, Dout)


def inputs_forward_seq_last(x, num, cat, wbd_t, offsets, *, tt=8192,
                            out_dtype=jnp.float32):
    """seq_last=True (lane-dense output). x:(B,Cx,T) num:(B,Cn,T) cat:(B,K,T)int
    -> (B, Cx+Cn+Etot, T)."""
    if num is None and cat is None:
        return x
    B, Cx, T = x.shape
    Cn = num.shape[1]
    K = cat.shape[1]
    Etot, Vtot = int(wbd_t.shape[0]), int(wbd_t.shape[1])
    Dout = Cx + Cn + Etot

    tt = int(tt)
    if T % 128 == 0:
        tt_eff = min(tt, T)
    elif T < tt:
        tt_eff = T            # one block equals the full (small/ragged) time axis
    else:
        tt_eff = tt           # multiple of 128; ragged tail masked by Pallas
    grid = (B, pl.cdiv(T, tt_eff))

    cf = cat.astype(jnp.int32)
    out_bytes = jnp.dtype(out_dtype).itemsize
    tbytes = jnp.dtype(wbd_t.dtype).itemsize
    R = B * T
    bytes_accessed = (R * Cx * x.dtype.itemsize + R * Cn * num.dtype.itemsize
                      + R * K * 4 + Vtot * Etot * tbytes + R * Dout * out_bytes)
    cost = pl.CostEstimate(flops=2 * R * Vtot * Etot, transcendentals=0,
                           bytes_accessed=int(bytes_accessed))

    per_step = ((tt_eff * (Cx + Cn) * 4 + tt_eff * K * 4 + tt_eff * Dout * out_bytes) * 2
                + Vtot * Etot * tbytes + tt_eff * Vtot * 4)
    vmem_limit = int(min(100 * 2**20, max(32 * 2**20, 3 * per_step)))

    kernel = functools.partial(_inputs_seq_last_kernel, offsets=offsets)
    out = pl.pallas_call(
        kernel,
        out_shape=jax.ShapeDtypeStruct((B, Dout, T), out_dtype),
        grid=grid,
        in_specs=[
            pl.BlockSpec((1, Cx, tt_eff), lambda b, t: (b, 0, t)),
            pl.BlockSpec((1, Cn, tt_eff), lambda b, t: (b, 0, t)),
            pl.BlockSpec((1, K, tt_eff), lambda b, t: (b, 0, t)),
            pl.BlockSpec((Etot, Vtot), lambda b, t: (0, 0)),
        ],
        out_specs=pl.BlockSpec((1, Dout, tt_eff), lambda b, t: (b, 0, t)),
        compiler_params=pltpu.CompilerParams(
            dimension_semantics=("parallel", "parallel"),
            vmem_limit_bytes=vmem_limit),
        cost_estimate=cost,
    )(x, num, cf, wbd_t)
    return out


# --------------------------------------------------------------------------- #
# Pure-JAX references
# --------------------------------------------------------------------------- #
def reference_forward(x, num, cat, embed_weights):
    embeds = [jnp.take(w, cat[:, :, d], axis=0)
              for d, w in enumerate(embed_weights)]
    return jnp.concatenate([x, num] + embeds, axis=2)


def reference_forward_seq_last(x, num, cat, embed_weights):
    embeds = [jnp.transpose(jnp.take(w, cat[:, d, :], axis=0), (0, 2, 1))
              for d, w in enumerate(embed_weights)]
    return jnp.concatenate([x, num] + embeds, axis=1)


if __name__ == "__main__":
    Dx, Dn = 8, 4
    cat_size = [(5, 4), (7, 4)]        # (vocab, embed_dim) per categorical feature
    Etot = sum(e for _, e in cat_size)

    key = jax.random.PRNGKey(0)
    kx, kn, kc, kw0, kw1 = jax.random.split(key, 5)

    # Xavier-normal embedding weights (matches reset_parameters intent).
    def xavier_normal(k, shape):
        fan_in, fan_out = shape
        std = (2.0 / (fan_in + fan_out)) ** 0.5
        return std * jax.random.normal(k, shape, dtype=jnp.float32)

    embed_weights = [xavier_normal(kw0, cat_size[0]),
                     xavier_normal(kw1, cat_size[1])]

    # Hoisted: fused block-diagonal table built once and reused for every call.
    # (table_dtype=jnp.bfloat16 halves the table and hits the bf16 MXU on v6e/v7x
    #  at the cost of bf16-rounded embeddings; f32 kept to match the reference.)
    wbd, wbd_t, offsets, _ = build_fused_table(embed_weights, table_dtype=jnp.float32)

    ok = True
    for (B, T) in [(2, 8), (2, 7)]:    # aligned and ragged sizes
        x = jax.random.normal(jax.random.fold_in(kx, T), (B, T, Dx), dtype=jnp.float32)
        num = jax.random.normal(jax.random.fold_in(kn, T), (B, T, Dn), dtype=jnp.float32)
        cat = jnp.stack(
            [jax.random.randint(jax.random.fold_in(kc, 10 * T + d), (B, T), 0, v)
             for d, (v, _) in enumerate(cat_size)], axis=-1).astype(jnp.int32)

        # seq_last=False path: (B, T, Dout)
        out = jax.block_until_ready(inputs_forward(x, num, cat, wbd, offsets))
        ref = reference_forward(x, num, cat, embed_weights)
        ok &= out.shape == (B, T, Dx + Dn + Etot)
        ok &= bool(jnp.allclose(out, ref, atol=1e-5, rtol=1e-5))

        # seq_last=True path (lane-dense output): (B, Dout, T)
        xs = jnp.transpose(x, (0, 2, 1))
        ns = jnp.transpose(num, (0, 2, 1))
        cs = jnp.transpose(cat, (0, 2, 1))
        out_s = jax.block_until_ready(inputs_forward_seq_last(xs, ns, cs, wbd_t, offsets))
        ref_s = reference_forward_seq_last(xs, ns, cs, embed_weights)
        ok &= out_s.shape == (B, Dx + Dn + Etot, T)
        ok &= bool(jnp.allclose(out_s, ref_s, atol=1e-5, rtol=1e-5))

    assert ok
    print("KERNEL_OK")
</pallas_src>

<mosaic_0001>
module attributes {stable_mosaic.version = 11 : i64} {
  func.func @_inputs_rows_kernel(%arg0: i32, %arg1: memref<16x8xf32, #tpu.memory_space<vmem>>, %arg2: memref<16x4xf32, #tpu.memory_space<vmem>>, %arg3: memref<16x2xi32, #tpu.memory_space<vmem>>, %arg4: memref<12x8xf32, #tpu.memory_space<vmem>>, %arg5: memref<16x20xf32, #tpu.memory_space<vmem>>) attributes {dimension_semantics = [#tpu.dimension_semantics<parallel>], iteration_bounds = array<i64: 1>, scalar_prefetch = 0 : i64, scratch_operands = 0 : i64, tpu.core_type = #tpu.core_type<tc>, window_params = [{transform_indices = @transform_0, window_bounds = array<i64: 16, 8>}, {transform_indices = @transform_1, window_bounds = array<i64: 16, 4>}, {transform_indices = @transform_2, window_bounds = array<i64: 16, 2>}, {pipeline_mode = #tpu.pipeline_mode<synchronous>, transform_indices = @transform_3, window_bounds = array<i64: 12, 8>}, {transform_indices = @transform_4, window_bounds = array<i64: 16, 20>}]} {
    %c0 = arith.constant 0 : index
    %c0_0 = arith.constant 0 : index
    %0 = vector.load %arg4[%c0, %c0_0] : memref<12x8xf32, #tpu.memory_space<vmem>>, vector<12x8xf32>
    %c0_1 = arith.constant 0 : index
    %c0_2 = arith.constant 0 : index
    %1 = vector.load %arg3[%c0_1, %c0_2] : memref<16x2xi32, #tpu.memory_space<vmem>>, vector<16x2xi32>
    %2 = tpu.iota {dimensions = array<i32: 1>} : vector<16x12xi32>
    %3 = vector.extract_strided_slice %1 {offsets = [0, 0], sizes = [16, 1], strides = [1, 1]} : vector<16x2xi32> to vector<16x1xi32>
    %c0_i32 = arith.constant 0 : i32
    %4 = vector.broadcast %c0_i32 : i32 to vector<16x1xi32>
    %5 = arith.addi %3, %4 : vector<16x1xi32>
    %6 = vector.broadcast %5 : vector<16x1xi32> to vector<16x12xi32>
    %7 = arith.cmpi eq, %6, %2 : vector<16x12xi32>
    %8 = vector.extract_strided_slice %1 {offsets = [0, 1], sizes = [16, 1], strides = [1, 1]} : vector<16x2xi32> to vector<16x1xi32>
    %c5_i32 = arith.constant 5 : i32
    %9 = vector.broadcast %c5_i32 : i32 to vector<16x1xi32>
    %10 = arith.addi %8, %9 : vector<16x1xi32>
    %11 = vector.broadcast %10 : vector<16x1xi32> to vector<16x12xi32>
    %12 = arith.cmpi eq, %11, %2 : vector<16x12xi32>
    %13 = arith.ori %7, %12 : vector<16x12xi1>
    %14 = arith.extui %13 : vector<16x12xi1> to vector<16x12xi32>
    %15 = arith.sitofp %14 : vector<16x12xi32> to vector<16x12xf32>
    %cst = arith.constant dense<0.000000e+00> : vector<16x8xf32>
    %16 = tpu.matmul %15, %0, %cst {dimension_numbers = #tpu.dot_dimension_numbers<[1], [0], [0], [1], [0, 0, 1, 1], [], []>} : vector<16x12xf32>, vector<12x8xf32>, vector<16x8xf32> -> vector<16x8xf32>
    %c0_3 = arith.constant 0 : index
    %c0_4 = arith.constant 0 : index
    %17 = vector.load %arg1[%c0_3, %c0_4] : memref<16x8xf32, #tpu.memory_space<vmem>>, vector<16x8xf32>
    %c0_5 = arith.constant 0 : index
    %c0_6 = arith.constant 0 : index
    %18 = vector.load %arg2[%c0_5, %c0_6] : memref<16x4xf32, #tpu.memory_space<vmem>>, vector<16x4xf32>
    %19 = tpu.concatenate %17, %18, %16 in 1 : vector<16x8xf32>, vector<16x4xf32>, vector<16x8xf32> -> vector<16x20xf32>
    %c0_7 = arith.constant 0 : index
    %c0_8 = arith.constant 0 : index
    %20 = vector.load %arg5[%c0_7, %c0_8] : memref<16x20xf32, #tpu.memory_space<vmem>>, vector<16x20xf32>
    tpu.vector_store %arg5[%c0_7, %c0_8], %19 {strides = array<i32>} : memref<16x20xf32, #tpu.memory_space<vmem>>, vector<16x20xf32>,
    return
  }
  func.func @transform_0(%arg0: i32) -> (i32, i32) {
    %c0_i32 = arith.constant 0 : i32
    %c0_i32_0 = arith.constant 0 : i32
    return %arg0, %c0_i32 : i32, i32
  }
  func.func @transform_1(%arg0: i32) -> (i32, i32) {
    %c0_i32 = arith.constant 0 : i32
    %c0_i32_0 = arith.constant 0 : i32
    return %arg0, %c0_i32 : i32, i32
  }
  func.func @transform_2(%arg0: i32) -> (i32, i32) {
    %c0_i32 = arith.constant 0 : i32
    %c0_i32_0 = arith.constant 0 : i32
    return %arg0, %c0_i32 : i32, i32
  }
  func.func @transform_3(%arg0: i32) -> (i32, i32) {
    %c0_i32 = arith.constant 0 : i32
    %c0_i32_0 = arith.constant 0 : i32
    %c0_i32_1 = arith.constant 0 : i32
    return %c0_i32, %c0_i32_0 : i32, i32
  }
  func.func @transform_4(%arg0: i32) -> (i32, i32) {
    %c0_i32 = arith.constant 0 : i32
    %c0_i32_0 = arith.constant 0 : i32
    return %arg0, %c0_i32 : i32, i32
  }
}

</mosaic_0001>

<bundles_post_ra>
// kernel: tpu_custom_call.1
= control target key start
LH: loop header
LB: loop body
LE: loop exit
PB: predicated region body
PF: predicated region fallthrough
CT: control target
= control target key end

     0   :  { %s293_s0 = inlined_call_operand.vmem [shape: f32[16,8], index: 0, kind: input, shape index: {}]   ;;  %s294_s1 = inlined_call_operand.vmem [shape: f32[16,4], index: 1, kind: input, shape index: {}]   ;;  %s295_s2 = inlined_call_operand.vmem [shape: s32[16,2], index: 2, kind: input, shape index: {}]   ;;  %s296_s3 = inlined_call_operand.vmem [shape: f32[12,8], index: 3, kind: input, shape index: {}]   ;;  %s297_s4 = inlined_call_operand.hbm [shape: f32[16,20], index: 4, kind: output, shape index: {}]  }
   0x1   :  { %v21_v0 = vld [vmem:[%s295_s2 + $0x8] sm:$0xff]  ;;  %v20_v1 = vld [vmem:[%s295_s2] sm:$0xff] }
   0x2   :  { %9 = vsyncpa [#allocation3], 0  ;;  %v227_v2 = vmov 0   ;;  %v19_v3 = vld [vmem:[%s296_s3 + $0x8] sm:$0xf]  ;;  %vm55_vm0 = vcmask 1043456   ;;  %v22_v10 = vlaneseq }
   0x3   :  { %203 = vset.pattern.permute.xlu1 %v227_v2  ;;  %201 = vset.pattern.permute.xlu0 %v227_v2  ;;  %v33_v4 = vadd.s32 5, %v21_v0  ;;  %v32_v5 = vadd.s32 5, %v20_v1  ;;  %v18_v6 = vld [vmem:[%s296_s3] sm:$0xff]  ;;  %v228_v7 = vmov 1   ;;  %v137_v8 = vld [vmem:[%s294_s1 + $0x8] sm:$0xff]  ;;  %s229_s26 = smov 8  }
   0x4   :  { %28 = vperm.xlu1 %203, %v21_v0   ;;  %25 = vperm.xlu0 %201, %v20_v1   ;;  %v136_v9 = vld [vmem:[%s294_s1] sm:$0xff]  ;;  %v23_v13 = vand.u32 127, %v22_v10  ;;  %vm48_vm6 = vcmask 97280   ;;  %v230_v16 = vmov 0.0   ;;  %s231_s1 = smov 12   ;;  %v135_v22 = vld [vmem:[%s293_s0 + $0x8] sm:$0xff] }
   0x5   :  { %187 = vmatprep.subr.msk.mxu0 %vm55_vm0, %v19_v3  ;;  %vm154_vm8 = vcmask 64512   ;;  %v134_v25 = vld [vmem:[%s293_s0] sm:$0xff]  ;;  %vm159_vm9 = vcmask 162816   ;;  %s232_s30 = smov [#allocation2]  }
   0x6   :  { %188 = vmatpush3.msk.msra.mxu0 %vm55_vm0, %v19_v3  ;;  %s167_s5 = sshll.u32 %s232_s30, 4  ;;  %s168_s5 = int_to_ptr.vmem [resolvable:$true] %s167_s5 }
   0x7   :  { %189 = vmatprep.subr.mxu0 %v18_v6  ;;  %s205_s6 = scalar_lea.vmem %s168_s5, 256  ;;  %p210_p1 = scmp.lt.s32.totalorder %s168_s5, %s168_s5 }
   0x8   :  { %204 = vset.pattern.permute.xlu1 %v228_v7  ;;  %202 = vset.pattern.permute.xlu0 %v228_v7  ;;  %p206_p0 = scmp.ne.s32.totalorder %s168_s5, %s205_s6  ;;  %p211_p2 = scmp.lt.s32.totalorder %s205_s6, %s205_s6 }
   0x9   :  { %38 = vperm.xlu1 %204, %v33_v4   ;;  %35 = vperm.xlu0 %202, %v32_v5  }
   0xa   :  { %190 = vmatpush3.msra.mxu0 %v18_v6  ;;  %p212_p3 = por %p211_p2, %p210_p1 }
   0xc   :  { %p213_p4 = pnand %p212_p3, %p206_p0 }
   0xd   :  { %142 = vrot.lane.b32.xlu0 %v137_v8, %s229_s26  ;;  %140 = vrot.lane.b32.xlu1 %v136_v9, %s229_s26 }
  0x7f   :  { %v26_v11 = vpop.permute.xlu0 %25  ;;  %v29_v12 = vpop.permute.xlu1 %28 }
  0x80   :  { %vm31_vm1 = vcmp.eq.s32.totalorder %v29_v12, %v23_v13  ;;  %vm30_vm4 = vcmp.eq.s32.totalorder %v26_v11, %v23_v13 }
  0x84   :  { %v39_v14 = vpop.permute.xlu1 %38  ;;  %v36_v15 = vpop.permute.xlu0 %35 }
  0x85   :  { %vm41_vm2 = vcmp.eq.s32.totalorder %v39_v14, %v23_v13  ;;  %vm40_vm3 = vcmp.eq.s32.totalorder %v36_v15, %v23_v13 }
  0x86   :  { %vm43_vm5 = vmor %vm31_vm1, %vm41_vm2 }
  0x87   :  { %vm42_vm7 = vmor %vm30_vm4, %vm40_vm3  ;;  %v179_v17 = vsel %vm43_vm5, 1.0, %v230_v16 }
  0x88   :  { %v178_v18 = vsel %vm42_vm7, 1.0, %v230_v16  ;;  %v143_v21 = vpop.permute.xlu0 %142  ;;  %v141_v23 = vpop.permute.xlu1 %140 }
  0x89   :  { %191 = vmatprep.mubr.msk.f32.mxu0 %vm48_vm6, %v178_v18  ;;  %v156_v24 = vsel %vm154_vm8, %v135_v22, %v143_v21  ;;  %v155_v28 = vsel %vm154_vm8, %v134_v25, %v141_v23 }
  0x8a   :  { %192 = vmatmul.mubr.msk.f32.vlgmr.msra.gmra.mxu0 %vm48_vm6, %v179_v17 }
 0x14a   :  { %v193_v19 = vpop.f32.mrf.mxu0 }
 0x14b   :  { %150 = vrot.lane.b32.xlu0 %v193_v19, %s231_s1 }
 0x14c   :  { %v125_v20 = vpop.f32.mrf.mxu0 }
 0x14d   :  { %148 = vrot.lane.b32.xlu1 %v125_v20, %s231_s1 }
 0x1bd   :  { %v151_v26 = vpop.permute.xlu0 %150 }
 0x1be   :  { %v158_v27 = vsel %vm48_vm6, %v156_v24, %v151_v26 }
 0x1bf   :  { %161 = vst.msk [vmem:[#allocation2 + $0x8] sm:$0xff] %vm159_vm9, %v158_v27  ;;  %v149_v29 = vpop.permute.xlu1 %148 }
 0x1c0   :  { %v157_v30 = vsel %vm48_vm6, %v155_v28, %v149_v29 }
 0x1c1   :  { %160 = vst.msk [vmem:[#allocation2] sm:$0xff] %vm159_vm9, %v157_v30 }
 0x1c2   :  { %216 = shalt.err (!%p213_p4)
}
 0x1c3   :  { %s233_s0 = smov 128  }
 0x1c4   :  { %173 = dma.vmem_to_hbm [thread:$0]  %s168_s5, 256, %s297_s4, [#allocation3], %s233_s0, %s233_s0, %s229_s26  }
 0x1c5   :  { %225 = dma.done.wait [#allocation3], 256  }
 0x1c6   :  { %226 = vsyncadd [#allocation3], 4294967040 }
 0x1c7   :  { %177 = vsyncpa [#allocation3], 1 }

</bundles_post_ra>
